<compile_context>
chip_gen: v5e
topology: v5e:2x2
jax: 0.10.0
libtpu: 0.0.40
codegen_flags: <defaults>
</compile_context>

<pallas_src>
import jax
import jax.numpy as jnp
from jax.experimental import pallas as pl
from jax.experimental.pallas import tpu as pltpu


# ----------------------------------------------------------------------------
# Fused kernel: x_flat @ W_a + b_a -> ReLU -> @ W2^T + b2
#   x_flat : (block_b, H*A)   W_a : (H*A, H)   b_a : (1, H)
#   W2t    : (H, A)           b2  : (1, A)     out : (block_b, A)
# ----------------------------------------------------------------------------
def actor_fused_kernel(x_ref, wa_ref, ba_ref, w2_ref, b2_ref, out_ref):
    f32 = jnp.float32
    # stage 1: folded (1x1 conv + out-channel sum + Linear1), then ReLU
    h = jnp.dot(x_ref[...], wa_ref[...], preferred_element_type=f32) + ba_ref[...]
    h = jnp.maximum(h, 0.0)
    # stage 2: Linear2
    out_ref[...] = (jnp.dot(h, w2_ref[...], preferred_element_type=f32)
                    + b2_ref[...]).astype(out_ref.dtype)


# ----------------------------------------------------------------------------
# Parameter folding (done once, parameter-side; exact up to float re-association)
#   conv_w : (6, H, 1, 1)   conv_b : (6,)
#   w1     : (H, A)  b1 : (H,)      (Linear(action_size, hidden_size))
#   w2     : (A, H)  b2 : (A,)      (Linear(hidden_size, action_size))
# ----------------------------------------------------------------------------
def fold_params(raw):
    conv_w = raw['conv_w'][:, :, 0, 0]                    # (6, H)
    w_eff = conv_w.sum(axis=0)                            # (H,)  sum over out-channels
    b_eff = raw['conv_b'].sum()                           # ()
    w1 = raw['w1']                                        # (H, A)
    hidden, action = w1.shape
    # W_a[c*A + m, j] = w_eff[c] * W1[j, m]
    w_a = (w_eff[:, None, None] * w1.T[None, :, :]).reshape(hidden * action, hidden)
    b_a = (b_eff * w1.sum(axis=1) + raw['b1'])[None, :]   # (1, H)
    return {
        'w_a': w_a.astype(jnp.float32),
        'b_a': b_a.astype(jnp.float32),
        'w2t': raw['w2'].T.astype(jnp.float32),           # (H, A)
        'b2': raw['b2'][None, :].astype(jnp.float32),     # (1, A)
    }


# ----------------------------------------------------------------------------
# Wrapper: single fused pallas_call, optional row-tiled grid
# ----------------------------------------------------------------------------
def actor_forward(folded, hidden_states):
    B = hidden_states.shape[0]
    x_flat = hidden_states.reshape(B, -1)                 # (B, H*A), contiguous -> free
    HA, hidden = folded['w_a'].shape
    action = folded['w2t'].shape[1]
    assert x_flat.shape[1] == HA, "input feature count does not match folded weight"

    # Row tile: whole batch when small; multiples of 8/128 rows when it scales,
    # so VMEM stays bounded and the grid can shard across cores (v7x).
    block_b = B
    for cand in (256, 128, 8):
        if B > cand and B % cand == 0:
            block_b = cand
            break
    grid = (B // block_b,)

    return pl.pallas_call(
        actor_fused_kernel,
        out_shape=jax.ShapeDtypeStruct((B, action), jnp.float32),
        grid=grid,
        in_specs=[
            pl.BlockSpec((block_b, HA), lambda i: (i, 0)),
            pl.BlockSpec((HA, hidden), lambda i: (0, 0)),
            pl.BlockSpec((1, hidden), lambda i: (0, 0)),
            pl.BlockSpec((hidden, action), lambda i: (0, 0)),
            pl.BlockSpec((1, action), lambda i: (0, 0)),
        ],
        out_specs=pl.BlockSpec((block_b, action), lambda i: (i, 0)),
        compiler_params=pltpu.CompilerParams(dimension_semantics=("parallel",)),
    )(x_flat, folded['w_a'], folded['b_a'], folded['w2t'], folded['b2'])


# ----------------------------------------------------------------------------
# Deterministic synthetic parameters (shapes follow the module __init__)
# ----------------------------------------------------------------------------
def init_params(key, hidden_size, action_size):
    ks = jax.random.split(key, 6)
    xav = (2.0 / (hidden_size + 6)) ** 0.5
    return {
        'conv_w': jax.random.normal(ks[0], (6, hidden_size, 1, 1), jnp.float32) * xav,
        'conv_b': jax.random.normal(ks[1], (6,), jnp.float32) * 0.05,
        'w1': jax.random.normal(ks[2], (hidden_size, action_size), jnp.float32)
              * (1.0 / action_size) ** 0.5,
        'b1': jax.random.normal(ks[3], (hidden_size,), jnp.float32) * 0.05,
        'w2': jax.random.normal(ks[4], (action_size, hidden_size), jnp.float32)
              * (1.0 / hidden_size) ** 0.5,
        'b2': jax.random.normal(ks[5], (action_size,), jnp.float32) * 0.05,
    }


# ----------------------------------------------------------------------------
# Pure-JAX reference that mirrors the PyTorch forward op-by-op (no folding)
# ----------------------------------------------------------------------------
def forward_ref(raw, hidden_states):
    B = hidden_states.shape[0]
    H = hidden_states.shape[-1]
    x_r = hidden_states.reshape(B, H, -1)                 # (B, H, A)  == torch.reshape
    wc = raw['conv_w'][:, :, 0, 0]                        # (6, H)
    conv = jnp.einsum('oc,bcm->bom', wc, x_r) + raw['conv_b'][None, :, None]
    y = conv.sum(axis=1)                                  # (B, A)  (.squeeze(-1).sum(1))
    h = jnp.maximum(y @ raw['w1'].T + raw['b1'][None, :], 0.0)
    return h @ raw['w2'].T + raw['b2'][None, :]


if __name__ == "__main__":
    BATCH, HIDDEN, ACTION = 4, 32, 16                     # ActorModel(hidden_size=32, action_size=16)
    key = jax.random.PRNGKey(0)
    k_x, k_p = jax.random.split(key)
    # input layout implied by forward(): (B, action_size, hidden_size)
    hidden_states = jax.random.normal(k_x, (BATCH, ACTION, HIDDEN), jnp.float32)

    raw_params = init_params(k_p, HIDDEN, ACTION)
    folded_params = fold_params(raw_params)               # one-time weight fold

    out = actor_forward(folded_params, hidden_states)
    jax.block_until_ready(out)

    ref = forward_ref(raw_params, hidden_states)
    assert out.shape == (BATCH, ACTION), f"bad output shape {out.shape}"
    assert jnp.allclose(out, ref, atol=1e-4, rtol=1e-3), "output mismatch vs reference"
    print("KERNEL_OK")
</pallas_src>

<mosaic_0001>
module attributes {stable_mosaic.version = 11 : i64} {
  func.func @actor_fused_kernel(%arg0: i32, %arg1: memref<4x512xf32, #tpu.memory_space<vmem>>, %arg2: memref<512x32xf32, #tpu.memory_space<vmem>>, %arg3: memref<1x32xf32, #tpu.memory_space<vmem>>, %arg4: memref<32x16xf32, #tpu.memory_space<vmem>>, %arg5: memref<1x16xf32, #tpu.memory_space<vmem>>, %arg6: memref<4x16xf32, #tpu.memory_space<vmem>>) attributes {dimension_semantics = [#tpu.dimension_semantics<parallel>], iteration_bounds = array<i64: 1>, scalar_prefetch = 0 : i64, scratch_operands = 0 : i64, tpu.core_type = #tpu.core_type<tc>, window_params = [{transform_indices = @transform_0, window_bounds = array<i64: 4, 512>}, {pipeline_mode = #tpu.pipeline_mode<synchronous>, transform_indices = @transform_1, window_bounds = array<i64: 512, 32>}, {pipeline_mode = #tpu.pipeline_mode<synchronous>, transform_indices = @transform_2, window_bounds = array<i64: 1, 32>}, {pipeline_mode = #tpu.pipeline_mode<synchronous>, transform_indices = @transform_3, window_bounds = array<i64: 32, 16>}, {pipeline_mode = #tpu.pipeline_mode<synchronous>, transform_indices = @transform_4, window_bounds = array<i64: 1, 16>}, {transform_indices = @transform_5, window_bounds = array<i64: 4, 16>}]} {
    %c0 = arith.constant 0 : index
    %c0_0 = arith.constant 0 : index
    %0 = vector.load %arg1[%c0, %c0_0] : memref<4x512xf32, #tpu.memory_space<vmem>>, vector<4x512xf32>
    %c0_1 = arith.constant 0 : index
    %c0_2 = arith.constant 0 : index
    %1 = vector.load %arg2[%c0_1, %c0_2] : memref<512x32xf32, #tpu.memory_space<vmem>>, vector<512x32xf32>
    %cst = arith.constant dense<0.000000e+00> : vector<4x32xf32>
    %2 = tpu.matmul %0, %1, %cst {dimension_numbers = #tpu.dot_dimension_numbers<[1], [0], [0], [1], [0, 0, 1, 1], [], []>} : vector<4x512xf32>, vector<512x32xf32>, vector<4x32xf32> -> vector<4x32xf32>
    %c0_3 = arith.constant 0 : index
    %c0_4 = arith.constant 0 : index
    %3 = vector.load %arg3[%c0_3, %c0_4] : memref<1x32xf32, #tpu.memory_space<vmem>>, vector<1x32xf32>
    %4 = vector.broadcast %3 : vector<1x32xf32> to vector<4x32xf32>
    %5 = arith.addf %2, %4 : vector<4x32xf32>
    %cst_5 = arith.constant 0.000000e+00 : f32
    %6 = vector.broadcast %cst_5 : f32 to vector<4x32xf32>
    %7 = arith.maximumf %5, %6 : vector<4x32xf32>
    %c0_6 = arith.constant 0 : index
    %c0_7 = arith.constant 0 : index
    %8 = vector.load %arg4[%c0_6, %c0_7] : memref<32x16xf32, #tpu.memory_space<vmem>>, vector<32x16xf32>
    %cst_8 = arith.constant dense<0.000000e+00> : vector<4x16xf32>
    %9 = tpu.matmul %7, %8, %cst_8 {dimension_numbers = #tpu.dot_dimension_numbers<[1], [0], [0], [1], [0, 0, 1, 1], [], []>} : vector<4x32xf32>, vector<32x16xf32>, vector<4x16xf32> -> vector<4x16xf32>
    %c0_9 = arith.constant 0 : index
    %c0_10 = arith.constant 0 : index
    %10 = vector.load %arg5[%c0_9, %c0_10] : memref<1x16xf32, #tpu.memory_space<vmem>>, vector<1x16xf32>
    %11 = vector.broadcast %10 : vector<1x16xf32> to vector<4x16xf32>
    %12 = arith.addf %9, %11 : vector<4x16xf32>
    %c0_11 = arith.constant 0 : index
    %c0_12 = arith.constant 0 : index
    %13 = vector.load %arg6[%c0_11, %c0_12] : memref<4x16xf32, #tpu.memory_space<vmem>>, vector<4x16xf32>
    tpu.vector_store %arg6[%c0_11, %c0_12], %12 {strides = array<i32>} : memref<4x16xf32, #tpu.memory_space<vmem>>, vector<4x16xf32>,
    return
  }
  func.func @transform_0(%arg0: i32) -> (i32, i32) {
    %c0_i32 = arith.constant 0 : i32
    %c0_i32_0 = arith.constant 0 : i32
    return %arg0, %c0_i32 : i32, i32
  }
  func.func @transform_1(%arg0: i32) -> (i32, i32) {
    %c0_i32 = arith.constant 0 : i32
    %c0_i32_0 = arith.constant 0 : i32
    %c0_i32_1 = arith.constant 0 : i32
    return %c0_i32, %c0_i32_0 : i32, i32
  }
  func.func @transform_2(%arg0: i32) -> (i32, i32) {
    %c0_i32 = arith.constant 0 : i32
    %c0_i32_0 = arith.constant 0 : i32
    %c0_i32_1 = arith.constant 0 : i32
    return %c0_i32, %c0_i32_0 : i32, i32
  }
  func.func @transform_3(%arg0: i32) -> (i32, i32) {
    %c0_i32 = arith.constant 0 : i32
    %c0_i32_0 = arith.constant 0 : i32
    %c0_i32_1 = arith.constant 0 : i32
    return %c0_i32, %c0_i32_0 : i32, i32
  }
  func.func @transform_4(%arg0: i32) -> (i32, i32) {
    %c0_i32 = arith.constant 0 : i32
    %c0_i32_0 = arith.constant 0 : i32
    %c0_i32_1 = arith.constant 0 : i32
    return %c0_i32, %c0_i32_0 : i32, i32
  }
  func.func @transform_5(%arg0: i32) -> (i32, i32) {
    %c0_i32 = arith.constant 0 : i32
    %c0_i32_0 = arith.constant 0 : i32
    return %arg0, %c0_i32 : i32, i32
  }
}

</mosaic_0001>

<bundles_post_ra>
// kernel: tpu_custom_call.1
= control target key start
LH: loop header
LB: loop body
LE: loop exit
PB: predicated region body
PF: predicated region fallthrough
CT: control target
= control target key end

     0   :  { %s515_s0 = inlined_call_operand.vmem [shape: f32[4,512], index: 0, kind: input, shape index: {}]   ;;  %s516_s1 = inlined_call_operand.vmem [shape: f32[512,32], index: 1, kind: input, shape index: {}]   ;;  %s517_s2 = inlined_call_operand.vmem [shape: f32[1,32], index: 2, kind: input, shape index: {}]   ;;  %s518_s3 = inlined_call_operand.vmem [shape: f32[32,16], index: 3, kind: input, shape index: {}]   ;;  %s519_s4 = inlined_call_operand.vmem [shape: f32[1,16], index: 4, kind: input, shape index: {}]   ;;  %s520_s5 = inlined_call_operand.hbm [shape: f32[4,16], index: 5, kind: output, shape index: {}]  }
   0x1   :  { %v70_v0 = vld [vmem:[%s516_s1 + $0x178] sm:$0xff]  ;;  %v69_v2 = vld [vmem:[%s516_s1 + $0x170] sm:$0xff]  ;;  %v68_v6 = vld [vmem:[%s516_s1 + $0x168] sm:$0xff] }
   0x2   :  { %v38_v1 = vld [vmem:[%s516_s1 + $0x78] sm:$0xff]  ;;  %144 = vmatpush.msra.mxu2 %v70_v0  ;;  %v37_v4 = vld [vmem:[%s516_s1 + $0x70] sm:$0xff]  ;;  %v36_v8 = vld [vmem:[%s516_s1 + $0x68] sm:$0xff] }
   0x3   :  { %104 = vmatpush.msra.mxu0 %v38_v1  ;;  %v86_v3 = vld [vmem:[%s516_s1 + $0x1f8] sm:$0xff]  ;;  %v85_v7 = vld [vmem:[%s516_s1 + $0x1f0] sm:$0xff]  ;;  %v84_v10 = vld [vmem:[%s516_s1 + $0x1e8] sm:$0xff] }
   0x4   :  { %v54_v5 = vld [vmem:[%s516_s1 + $0xf8] sm:$0xff]  ;;  %164 = vmatpush.msra.mxu3 %v86_v3  ;;  %145 = vmatpush.msra.mxu2 %v69_v2  ;;  %v53_v9 = vld [vmem:[%s516_s1 + $0xf0] sm:$0xff]  ;;  %v67_v11 = vld [vmem:[%s516_s1 + $0x160] sm:$0xff] }
   0x5   :  { %124 = vmatpush.msra.mxu1 %v54_v5  ;;  %105 = vmatpush.msra.mxu0 %v37_v4  ;;  %v35_v12 = vld [vmem:[%s516_s1 + $0x60] sm:$0xff]  ;;  %v52_v13 = vld [vmem:[%s516_s1 + $0xe8] sm:$0xff]  ;;  %v66_v16 = vld [vmem:[%s516_s1 + $0x158] sm:$0xff] }
   0x6   :  { %165 = vmatpush.msra.mxu3 %v85_v7  ;;  %146 = vmatpush.msra.mxu2 %v68_v6  ;;  %v83_v14 = vld [vmem:[%s516_s1 + $0x1e0] sm:$0xff]  ;;  %v34_v17 = vld [vmem:[%s516_s1 + $0x58] sm:$0xff]  ;;  %v65_v20 = vld [vmem:[%s516_s1 + $0x150] sm:$0xff] }
   0x7   :  { %125 = vmatpush.msra.mxu1 %v53_v9  ;;  %106 = vmatpush.msra.mxu0 %v36_v8  ;;  %v51_v15 = vld [vmem:[%s516_s1 + $0xe0] sm:$0xff]  ;;  %v82_v18 = vld [vmem:[%s516_s1 + $0x1d8] sm:$0xff]  ;;  %v33_v21 = vld [vmem:[%s516_s1 + $0x50] sm:$0xff] }
   0x8   :  { %166 = vmatpush.msra.mxu3 %v84_v10  ;;  %147 = vmatpush.msra.mxu2 %v67_v11  ;;  %v50_v19 = vld [vmem:[%s516_s1 + $0xd8] sm:$0xff]  ;;  %v81_v22 = vld [vmem:[%s516_s1 + $0x1d0] sm:$0xff]  ;;  %v64_v24 = vld [vmem:[%s516_s1 + $0x148] sm:$0xff] }
   0x9   :  { %126 = vmatpush.msra.mxu1 %v52_v13  ;;  %107 = vmatpush.msra.mxu0 %v35_v12  ;;  %v49_v23 = vld [vmem:[%s516_s1 + $0xd0] sm:$0xff]  ;;  %v32_v25 = vld [vmem:[%s516_s1 + $0x48] sm:$0xff]  ;;  %v63_v28 = vld [vmem:[%s516_s1 + $0x140] sm:$0xff] }
   0xa   :  { %167 = vmatpush.msra.mxu3 %v83_v14  ;;  %148 = vmatpush.msra.mxu2 %v66_v16  ;;  %v80_v26 = vld [vmem:[%s516_s1 + $0x1c8] sm:$0xff]  ;;  %v31_v29 = vld [vmem:[%s516_s1 + $0x40] sm:$0xff]  ;;  %v62_v32 = vld [vmem:[%s516_s1 + $0x138] sm:$0xff] }
   0xb   :  { %127 = vmatpush.msra.mxu1 %v51_v15  ;;  %108 = vmatpush.msra.mxu0 %v34_v17  ;;  %v48_v27 = vld [vmem:[%s516_s1 + $0xc8] sm:$0xff]  ;;  %v79_v30 = vld [vmem:[%s516_s1 + $0x1c0] sm:$0xff]  ;;  %v30_v33 = vld [vmem:[%s516_s1 + $0x38] sm:$0xff] }
   0xc   :  { %168 = vmatpush.msra.mxu3 %v82_v18  ;;  %149 = vmatpush.msra.mxu2 %v65_v20  ;;  %v47_v31 = vld [vmem:[%s516_s1 + $0xc0] sm:$0xff]  ;;  %v78_v34 = vld [vmem:[%s516_s1 + $0x1b8] sm:$0xff]  ;;  %v61_v36 = vld [vmem:[%s516_s1 + $0x130] sm:$0xff] }
   0xd   :  { %128 = vmatpush.msra.mxu1 %v50_v19  ;;  %109 = vmatpush.msra.mxu0 %v33_v21  ;;  %v46_v35 = vld [vmem:[%s516_s1 + $0xb8] sm:$0xff]  ;;  %v29_v37 = vld [vmem:[%s516_s1 + $0x30] sm:$0xff]  ;;  %v60_v40 = vld [vmem:[%s516_s1 + $0x128] sm:$0xff] }
   0xe   :  { %169 = vmatpush.msra.mxu3 %v81_v22  ;;  %150 = vmatpush.msra.mxu2 %v64_v24  ;;  %v77_v38 = vld [vmem:[%s516_s1 + $0x1b0] sm:$0xff]  ;;  %v28_v41 = vld [vmem:[%s516_s1 + $0x28] sm:$0xff]  ;;  %v59_v42 = vld [vmem:[%s516_s1 + $0x120] sm:$0xff] }
   0xf   :  { %129 = vmatpush.msra.mxu1 %v49_v23  ;;  %110 = vmatpush.msra.mxu0 %v32_v25  ;;  %v45_v39 = vld [vmem:[%s516_s1 + $0xb0] sm:$0xff]  ;;  %v76_v43 = vld [vmem:[%s516_s1 + $0x1a8] sm:$0xff]  ;;  %v27_v45 = vld [vmem:[%s516_s1 + $0x20] sm:$0xff] }
  0x10   :  { %170 = vmatpush.msra.mxu3 %v80_v26  ;;  %151 = vmatpush.msra.mxu2 %v63_v28  ;;  %v44_v44 = vld [vmem:[%s516_s1 + $0xa8] sm:$0xff]  ;;  %v58_v46 = vld [vmem:[%s516_s1 + $0x118] sm:$0xff]  ;;  %v75_v48 = vld [vmem:[%s516_s1 + $0x1a0] sm:$0xff] }
  0x11   :  { %130 = vmatpush.msra.mxu1 %v48_v27  ;;  %111 = vmatpush.msra.mxu0 %v31_v29  ;;  %v22_v47 = vld [vmem:[%s515_s0 + $0x8] sm:$0xff]  ;;  %v43_v49 = vld [vmem:[%s516_s1 + $0xa0] sm:$0xff]  ;;  %v26_v51 = vld [vmem:[%s516_s1 + $0x18] sm:$0xff] }
  0x12   :  { %171 = vmatpush.msra.mxu3 %v79_v30  ;;  %152 = vmatpush.msra.mxu2 %v62_v32  ;;  %95 = vst [vmem:[#allocation1 + $0x10] ss:$2 sm:$0xff] %v22_v47  ;;  %v21_v50 = vld [vmem:[%s515_s0] sm:$0xff]  ;;  %v74_v52 = vld [vmem:[%s516_s1 + $0x198] sm:$0xff] }
  0x13   :  { %131 = vmatpush.msra.mxu1 %v47_v31  ;;  %112 = vmatpush.msra.mxu0 %v30_v33  ;;  %93 = vst [vmem:[#allocation1] ss:$2 sm:$0xff] %v21_v50  ;;  %v42_v53 = vld [vmem:[%s516_s1 + $0x98] sm:$0xff] }
  0x14   :  { %172 = vmatpush.msra.mxu3 %v78_v34  ;;  %153 = vmatpush.msra.mxu2 %v61_v36 }
  0x15   :  { %132 = vmatpush.msra.mxu1 %v46_v35  ;;  %113 = vmatpush.msra.mxu0 %v29_v37 }
  0x16   :  { %173 = vmatpush.msra.mxu3 %v77_v38  ;;  %154 = vmatpush.msra.mxu2 %v60_v40 }
  0x17   :  { %133 = vmatpush.msra.mxu1 %v45_v39  ;;  %114 = vmatpush.msra.mxu0 %v28_v41 }
  0x18   :  { %174 = vmatpush.msra.mxu3 %v76_v43  ;;  %155 = vmatpush.msra.mxu2 %v59_v42 }
  0x19   :  { %134 = vmatpush.msra.mxu1 %v44_v44  ;;  %115 = vmatpush.msra.mxu0 %v27_v45 }
  0x1a   :  { %10 = vsyncpa [#allocation3], 0  ;;  %175 = vmatpush.msra.mxu3 %v75_v48  ;;  %v57_v54 = vld [vmem:[%s516_s1 + $0x110] sm:$0xff]  ;;  %156 = vmatpush.msra.mxu2 %v58_v46  ;;  %v56_v58 = vld [vmem:[%s516_s1 + $0x108] sm:$0xff]  ;;  %vm193_vm0 = vcmask 261120   ;;  %vm217_vm1 = vcmask 125952  }
  0x1b   :  { %135 = vmatpush.msra.mxu1 %v43_v49  ;;  %v25_v55 = vld [vmem:[%s516_s1 + $0x10] sm:$0xff]  ;;  %116 = vmatpush.msra.mxu0 %v26_v51  ;;  %v24_v59 = vld [vmem:[%s516_s1 + $0x8] sm:$0xff]  ;;  %v55_v62 = vld [vmem:[%s516_s1 + $0x100] sm:$0xff] }
  0x1c   :  { %v73_v56 = vld [vmem:[%s516_s1 + $0x190] sm:$0xff]  ;;  %176 = vmatpush.msra.mxu3 %v74_v52  ;;  %157 = vmatpush.msra.mxu2 %v57_v54  ;;  %v72_v60 = vld [vmem:[%s516_s1 + $0x188] sm:$0xff]  ;;  %v23_v63 = vld [vmem:[%s516_s1] sm:$0xff] }
  0x1d   :  { %v41_v57 = vld [vmem:[%s516_s1 + $0x90] sm:$0xff]  ;;  %136 = vmatpush.msra.mxu1 %v42_v53  ;;  %117 = vmatpush.msra.mxu0 %v25_v55  ;;  %v40_v61 = vld [vmem:[%s516_s1 + $0x88] sm:$0xff]  ;;  %v71_v1 = vld [vmem:[%s516_s1 + $0x180] sm:$0xff] }
  0x1e   :  { %177 = vmatpush.msra.mxu3 %v73_v56  ;;  %158 = vmatpush.msra.mxu2 %v56_v58  ;;  %v98_v0 = vld.sshfl [vmem:[#allocation1 + $0x10] sm:$0xff pattern:$0x75316420]  ;;  %v96_v2 = vld.sshfl [vmem:[#allocation1] sm:$0xff pattern:$0x75316420] }
  0x1f   :  { %137 = vmatpush.msra.mxu1 %v41_v57  ;;  %118 = vmatpush.msra.mxu0 %v24_v59  ;;  %v99_v3 = vld.sshfl [vmem:[#allocation1 + $0x18] sm:$0xff pattern:$0x75316420]  ;;  %v39_v4 = vld [vmem:[%s516_s1 + $0x80] sm:$0xff]  ;;  %v187_v7 = vld [vmem:[%s518_s3 + $0x10] sm:$0xff] }
  0x20   :  { %178 = vmatpush.msra.mxu3 %v72_v60  ;;  %159 = vmatpush.msra.mxu2 %v55_v62  ;;  %v97_v5 = vld.sshfl [vmem:[#allocation1 + $0x8] sm:$0xff pattern:$0x75316420]  ;;  %v188_v6 = vld [vmem:[%s518_s3 + $0x18] sm:$0xff]  ;;  %v185_v9 = vld [vmem:[%s518_s3] sm:$0xff] }
  0x21   :  { %138 = vmatpush.msra.mxu1 %v40_v61  ;;  %119 = vmatpush.msra.mxu0 %v23_v63  ;;  %v186_v8 = vld [vmem:[%s518_s3 + $0x8] sm:$0xff]  ;;  %v237_v10 = vld [vmem:[%s517_s2] ss:$0 sm:$0xff]  ;;  %s265_s3 = smov [#allocation2]   ;;  %s226_s2 = sshll.u32 %s520_s5, 4  ;;  %s227_s2 = int_to_ptr.hbm [resolvable:$true] %s226_s2 }
  0x22   :  { %160 = vmatmul.f32.vlgmr.msra.gmra.mxu2 %v98_v0  ;;  %179 = vmatpush.msra.mxu3 %v71_v1  ;;  %v238_v20 = vld [vmem:[%s519_s4] ss:$0 sm:$0xff]  ;;  %s224_s9 = sshll.u32 %s265_s3, 4  ;;  %s225_s9 = int_to_ptr.vmem [resolvable:$true] %s224_s9 }
  0x23   :  { %120 = vmatmul.f32.vlgmr.msra.gmra.mxu0 %v96_v2  ;;  %180 = vmatmul.f32.vlgmr.msra.gmra.mxu3 %v99_v3 }
  0x24   :  { %139 = vmatpush.msra.mxu1 %v39_v4  ;;  %209 = vmatpush.msrb.mxu0 %v188_v6 }
  0x25   :  { %140 = vmatmul.f32.vlgmr.msra.gmra.mxu1 %v97_v5 }
  0x26   :  { %210 = vmatpush.msrb.mxu0 %v187_v7 }
  0x28   :  { %211 = vmatpush.msrb.mxu0 %v186_v8 }
  0x2a   :  { %212 = vmatpush.msrb.mxu0 %v185_v9 }
  0xa0   :  { %v121_v11 = vpop.f32.mrf.mxu0 }
  0xa1   :  { %v122_v12 = vadd.f32 %v237_v10, %v121_v11 }
  0xa2   :  { %v141_v13 = vpop.f32.mrf.mxu1 }
  0xa3   :  { %v142_v14 = vadd.f32 %v141_v13, %v122_v12 }
  0xa5   :  { %v161_v15 = vpop.f32.mrf.mxu2 }
  0xa6   :  { %v162_v16 = vadd.f32 %v161_v15, %v142_v14  ;;  %v181_v17 = vpop.f32.mrf.mxu3 }
  0xa8   :  { %v182_v18 = vadd.f32 %v181_v17, %v162_v16 }
  0xaa   :  { %v184_v19 = vmax.f32 %v182_v18, 0.0 }
  0xac   :  { %235 = vmatmul.msk.f32.vlgmr.msrb.gmra.mxu0 %vm193_vm0, %v184_v19 }
 0x129   :  { %v214_v21 = vpop.f32.mrf.mxu0 }
 0x12a   :  { %v215_v22 = vadd.f32 %v238_v20, %v214_v21 }
 0x12c   :  { %218 = vst.msk [vmem:[#allocation2] sm:$0xf] %vm217_vm1, %v215_v22 }
 0x12d   :  { %229 = dma.vmem_to_hbm [thread:$0]  %s225_s9, 64, %s227_s2, [#allocation3]  }
 0x12e   :  { %263 = dma.done.wait [#allocation3], 64  }
 0x12f   :  { %264 = vsyncadd [#allocation3], 4294967232 }
 0x130   :  { %234 = vsyncpa [#allocation3], 1 }

</bundles_post_ra>
